<compile_context>
chip_gen: v7x
topology: tpu7x:2x2x1
jax: 0.10.0
libtpu: 0.0.40
codegen_flags: <defaults>
</compile_context>

<pallas_src>
import math

import jax
import jax.numpy as jnp
from jax.experimental import pallas as pl
from jax.experimental.pallas import tpu as pltpu


# ---------------------------------------------------------------------------
# Module-init buffer (mirrors the PyTorch __init__, built once, host-side JAX)
# ---------------------------------------------------------------------------
def make_positional_encoding(emb_size, max_len=5000, dtype=jnp.float32):
    """pe[p, 2i] = sin(p * w_i), pe[p, 2i+1] = cos(p * w_i); shape (max_len, E)."""
    assert emb_size % 2 == 0, "emb_size must be even (as in the PyTorch module)"
    position = jnp.arange(max_len, dtype=jnp.float32)[:, None]            # (max_len, 1)
    div_term = jnp.exp(
        jnp.arange(0, emb_size, 2, dtype=jnp.float32)
        * (-math.log(10000.0) / emb_size))                                # (E/2,)
    angles = position * div_term                                          # (max_len, E/2)
    pe = jnp.zeros((max_len, emb_size), jnp.float32)
    pe = pe.at[:, 0::2].set(jnp.sin(angles))
    pe = pe.at[:, 1::2].set(jnp.cos(angles))
    return pe.astype(dtype)


# ---------------------------------------------------------------------------
# Kernels (pure VPU broadcast add — HBM-bandwidth bound)
# ---------------------------------------------------------------------------
def _add_pe_row_kernel(x_ref, pe_ref, o_ref):
    # x_ref: (tb, tl), pe_ref: (1, tl) broadcast over the batch sublanes.
    o_ref[...] = x_ref[...] + pe_ref[...]


def _add_pe_3d_kernel(x_ref, pe_ref, o_ref):
    # x_ref: (1, ts, E), pe_ref: (ts, E) broadcast over the leading batch dim.
    o_ref[...] = x_ref[...] + pe_ref[...]


# ---------------------------------------------------------------------------
# Tiling helpers
# ---------------------------------------------------------------------------
def _sublane_unit(dtype):
    """Native sublane packing unit: 8 for 32-bit, 16 for 16-bit, 32 for 8-bit."""
    return {4: 8, 2: 16, 1: 32}.get(jnp.dtype(dtype).itemsize, 8)


def _lane_tile(lane_dim, target_elems, unit):
    """Lane tile: multiple of 128 (<= lane_dim), or the full dim when < 128."""
    if lane_dim < 128:
        return lane_dim
    cap = max(128, (target_elems // unit) // 128 * 128)
    return min((lane_dim // 128) * 128, cap)


def _sublane_tile(row_dim, lane_tile, target_elems, unit):
    """Sublane tile: multiple of `unit` (<= row_dim), or full dim when < unit."""
    if row_dim < unit:
        return row_dim                       # full-extent block is always legal
    budget = max(unit, (target_elems // max(lane_tile, 1)) // unit * unit)
    return min((row_dim // unit) * unit, budget)


# ---------------------------------------------------------------------------
# Forward
# ---------------------------------------------------------------------------
def positional_encoding_forward(x, pe, *, target_block_bytes=2 << 20,
                                vmem_limit_bytes=48 << 20):
    """x: (B, S, E), pe: (max_len, E)  ->  x + pe[None, :S, :]."""
    B, S, E = x.shape
    assert pe.shape[0] >= S and pe.shape[1] == E, (pe.shape, x.shape)

    pe_s = pe[:S]                            # static slice (cheap under jit)
    if pe_s.dtype != x.dtype:
        pe_s = pe_s.astype(x.dtype)

    itemsize = jnp.dtype(x.dtype).itemsize
    unit = _sublane_unit(x.dtype)
    target_elems = max(target_block_bytes // itemsize, unit * 128)

    compiler_params = pltpu.CompilerParams(
        dimension_semantics=("parallel", "parallel"),
        vmem_limit_bytes=vmem_limit_bytes)

    # ---- Path B: small batch + lane-dense E -> pack sublanes with seq rows ----
    if B < unit and E % 128 == 0:
        ts = _sublane_tile(S, E, target_elems, unit)
        grid = (pl.cdiv(S, ts), B)           # batch innermost: PE tile DMA'd once per s-block
        return pl.pallas_call(
            _add_pe_3d_kernel,
            out_shape=jax.ShapeDtypeStruct((B, S, E), x.dtype),
            grid=grid,
            in_specs=[
                pl.BlockSpec((1, ts, E), lambda s, b: (b, s, 0)),   # x
                pl.BlockSpec((ts, E), lambda s, b: (s, 0)),         # PE (batch-invariant)
            ],
            out_specs=pl.BlockSpec((1, ts, E), lambda s, b: (b, s, 0)),
            compiler_params=compiler_params,
        )(x, pe_s)

    # ---- Path A: (B, S*E) lane-dense rows, one PE row shared across the batch ----
    SE = S * E
    x2 = x.reshape(B, SE)                    # contiguous row-major reshape: no HBM copy
    pe2 = pe_s.reshape(1, SE)

    tl = _lane_tile(SE, target_elems, unit)
    tb = _sublane_tile(B, tl, target_elems, unit)
    grid = (pl.cdiv(SE, tl), pl.cdiv(B, tb))  # batch innermost -> PE re-DMA elided

    out = pl.pallas_call(
        _add_pe_row_kernel,
        out_shape=jax.ShapeDtypeStruct((B, SE), x.dtype),
        grid=grid,
        in_specs=[
            pl.BlockSpec((tb, tl), lambda j, b: (b, j)),            # x tile
            pl.BlockSpec((1, tl), lambda j, b: (0, j)),             # PE row (batch-invariant)
        ],
        out_specs=pl.BlockSpec((tb, tl), lambda j, b: (b, j)),
        compiler_params=compiler_params,
    )(x2, pe2)
    return out.reshape(B, S, E)


# ---------------------------------------------------------------------------
# Self-test
# ---------------------------------------------------------------------------
if __name__ == "__main__":
    key = jax.random.PRNGKey(0)
    fwd = jax.jit(positional_encoding_forward)

    max_len = 64
    tests = [
        (2, 8, 32),     # tiny toy shape (matches the module's forward): path A, 1 block
        (2, 20, 128),   # small batch, lane-dense E: packed 3-D path, ragged S edge
        (9, 7, 24),     # ragged batch + ragged lane edge on the (B, S*E) path
    ]

    for (B, S, E) in tests:
        kx, key = jax.random.split(key)
        x = jax.random.normal(kx, (B, S, E), jnp.float32)
        pe = make_positional_encoding(E, max_len, dtype=x.dtype)   # module-init buffer
        out = jax.block_until_ready(fwd(x, pe))
        ref = x + pe[None, :S, :]
        assert out.shape == x.shape and out.dtype == x.dtype, (out.shape, out.dtype)
        assert jnp.allclose(out, ref, atol=1e-6, rtol=1e-6), (B, S, E)

    print("KERNEL_OK")
</pallas_src>

<mosaic_0001>
module attributes {stable_mosaic.version = 11 : i64} {
  func.func @_add_pe_row_kernel(%arg0: i32, %arg1: i32, %arg2: memref<2x256xf32, #tpu.memory_space<vmem>>, %arg3: memref<1x256xf32, #tpu.memory_space<vmem>>, %arg4: memref<2x256xf32, #tpu.memory_space<vmem>>) attributes {dimension_semantics = [#tpu.dimension_semantics<parallel>, #tpu.dimension_semantics<parallel>], iteration_bounds = array<i64: 1, 1>, scalar_prefetch = 0 : i64, scratch_operands = 0 : i64, tpu.core_type = #tpu.core_type<tc>, window_params = [{transform_indices = @transform_0, window_bounds = array<i64: 2, 256>}, {transform_indices = @transform_1, window_bounds = array<i64: 1, 256>}, {transform_indices = @transform_2, window_bounds = array<i64: 2, 256>}]} {
    %c0 = arith.constant 0 : index
    %c0_0 = arith.constant 0 : index
    %0 = vector.load %arg2[%c0, %c0_0] : memref<2x256xf32, #tpu.memory_space<vmem>>, vector<2x256xf32>
    %c0_1 = arith.constant 0 : index
    %c0_2 = arith.constant 0 : index
    %1 = vector.load %arg3[%c0_1, %c0_2] : memref<1x256xf32, #tpu.memory_space<vmem>>, vector<1x256xf32>
    %2 = vector.broadcast %1 : vector<1x256xf32> to vector<2x256xf32>
    %3 = arith.addf %0, %2 : vector<2x256xf32>
    %c0_3 = arith.constant 0 : index
    %c0_4 = arith.constant 0 : index
    %4 = vector.load %arg4[%c0_3, %c0_4] : memref<2x256xf32, #tpu.memory_space<vmem>>, vector<2x256xf32>
    tpu.vector_store %arg4[%c0_3, %c0_4], %3 {strides = array<i32>} : memref<2x256xf32, #tpu.memory_space<vmem>>, vector<2x256xf32>,
    return
  }
  func.func @transform_0(%arg0: i32, %arg1: i32) -> (i32, i32) {
    %c0_i32 = arith.constant 0 : i32
    return %arg1, %arg0 : i32, i32
  }
  func.func @transform_1(%arg0: i32, %arg1: i32) -> (i32, i32) {
    %c0_i32 = arith.constant 0 : i32
    %c0_i32_0 = arith.constant 0 : i32
    return %c0_i32, %arg0 : i32, i32
  }
  func.func @transform_2(%arg0: i32, %arg1: i32) -> (i32, i32) {
    %c0_i32 = arith.constant 0 : i32
    return %arg1, %arg0 : i32, i32
  }
}

</mosaic_0001>

<bundles_post_ra>
// kernel: positional_encoding_forward.1
= control target key start
LH: loop header
LB: loop body
LE: loop exit
PB: predicated region body
PF: predicated region fallthrough
CT: control target
= control target key end

     0   :  { %v14_v0 = vlaneseq  ;;  %v38_v1 = vmov 1983009808   ;;  %s63_s1 = inlined_call_operand.vmem [shape: f32[1,256], index: 1, kind: input, shape index: {}]   ;;  %s64_s0 = inlined_call_operand.vmem [shape: f32[2,256], index: 0, kind: input, shape index: {}]   ;;  %s65_s2 = inlined_call_operand.vmem [shape: f32[2,256], index: 2, kind: output, shape index: {}]  }
   0x1   :  { %v24_v2 = vunpack.c.l.s4 %v38_v1  ;;  %v12_v4 = vld [vmem:[%s63_s1] sm:$0x3] }
   0x2   :  { %v15_v3 = vshrl.u32 %v14_v0, 7  ;;  %v11_v12 = vld [vmem:[%s64_s0] sm:$0xf] }
   0x3   :  { %v25_v5 = vunpack.c.0.s8 %v24_v2 }
   0x4   :  { %v16_v6 = vsub.s32 0, %v15_v3  ;;  %v20_v7 = vsub.s32 1, %v15_v3 }
   0x5   :  { %v28_v10 = vsub.s32 %v25_v5, %v15_v3 }
   0x6   :  { %v17_v8 = vrot.slane %v12_v4, %v16_v6  ;;  %v21_v9 = vrot.slane %v12_v4, %v20_v7 }
   0x8   :  { %v22_v11 = vcombine.low %v17_v8, %v21_v9 }
   0xa   :  { %v29_v13 = vrot.slane %v22_v11, %v28_v10 }
   0xc   :  { %v31_v14 = vadd.f32 %v29_v13, %v11_v12 }
   0xe   :  { %32 = vst [vmem:[%s65_s2] sm:$0xf] %v31_v14 }

</bundles_post_ra>
